<compile_context>
chip_gen: v6e
topology: v6e:2x2x1
jax: 0.10.0
libtpu: 0.0.40
codegen_flags: <defaults>
</compile_context>

<pallas_src>
import functools

import jax
import jax.numpy as jnp
from jax import random
from jax.experimental import pallas as pl
from jax.experimental.pallas import tpu as pltpu


_VMEM_TILE_BUDGET = 22 * 1024 * 1024   # estimate for all double-buffered tiles
_VMEM_LIMIT_BYTES = 32 * 1024 * 1024   # scoped VMEM limit (fits v5e/v6e/v7x)


# ----------------------------------------------------------------------------
# Fused matmul kernel:  out = act((A @ B) * scale + shift [+ residual])
# ----------------------------------------------------------------------------
def _make_fused_matmul_kernel(activation, has_residual):
    def kernel(*refs):
        if has_residual:
            a_ref, b_ref, s_ref, t_ref, r_ref, o_ref, acc_ref = refs
        else:
            a_ref, b_ref, s_ref, t_ref, o_ref, acc_ref = refs
            r_ref = None
        k = pl.program_id(2)

        @pl.when(k == 0)
        def _():
            acc_ref[...] = jnp.zeros_like(acc_ref)

        acc_ref[...] += jnp.dot(a_ref[...], b_ref[...],
                                preferred_element_type=jnp.float32)

        @pl.when(k == pl.num_programs(2) - 1)
        def _():
            y = acc_ref[...] * s_ref[...] + t_ref[...]
            if has_residual:
                y = y + r_ref[...].astype(jnp.float32)   # residual add in f32
            if activation == "relu":
                y = jnp.maximum(y, 0.0)
            elif activation == "tanh":
                y = jnp.tanh(y)
            o_ref[...] = y.astype(o_ref.dtype)

    return kernel


def _tile_bytes(tm, tn, tk, has_residual, out_bytes):
    sz = 2 * tm * tk * 2          # A (bf16), double-buffered
    sz += 2 * tk * tn * 2         # B (bf16), double-buffered
    if has_residual:
        sz += 2 * tm * tn * 2     # residual (bf16), double-buffered
    sz += 2 * tm * tn * out_bytes  # output, double-buffered
    sz += tm * tn * 4              # f32 accumulator scratch
    sz += 2 * 2 * tn * 4           # scale + shift
    return sz


def _pick_tiles(M, K, N, has_residual, out_bytes):
    tm = M if M <= 256 else 256
    assert M % tm == 0, (M, tm)
    tn = N if N <= 512 else 512
    assert N % tn == 0, (N, tn)
    # Keep at least 2 "parallel" output tiles so v7x's 2nd TensorCore has work.
    if (M // tm) * (N // tn) < 2 and tn % 256 == 0:
        tn //= 2
    # Largest k-tile (multiple of 128, or full K) that fits the VMEM budget.
    cands = [d for d in range(K, 0, -1)
             if K % d == 0 and (d % 128 == 0 or d == K)]
    tk = cands[-1]
    for d in cands:
        if _tile_bytes(tm, tn, d, has_residual, out_bytes) <= _VMEM_TILE_BUDGET:
            tk = d
            break
    return tm, tn, tk


@functools.lru_cache(maxsize=None)
def _build_fused_matmul(M, K, N, activation, has_residual, out_dtype_name):
    out_dtype = jnp.bfloat16 if out_dtype_name == "bfloat16" else jnp.float32
    out_bytes = 2 if out_dtype_name == "bfloat16" else 4
    tm, tn, tk = _pick_tiles(M, K, N, has_residual, out_bytes)
    grid = (M // tm, N // tn, K // tk)

    in_specs = [
        pl.BlockSpec((tm, tk), lambda i, j, k: (i, k)),   # A (bf16)
        pl.BlockSpec((tk, tn), lambda i, j, k: (k, j)),   # B (bf16)
        pl.BlockSpec((1, tn), lambda i, j, k: (0, j)),    # scale (f32)
        pl.BlockSpec((1, tn), lambda i, j, k: (0, j)),    # shift (f32)
    ]
    if has_residual:
        in_specs.append(pl.BlockSpec((tm, tn), lambda i, j, k: (i, j)))

    return pl.pallas_call(
        _make_fused_matmul_kernel(activation, has_residual),
        out_shape=jax.ShapeDtypeStruct((M, N), out_dtype),
        grid_spec=pltpu.PrefetchScalarGridSpec(
            num_scalar_prefetch=0,
            grid=grid,
            in_specs=in_specs,
            out_specs=pl.BlockSpec((tm, tn), lambda i, j, k: (i, j)),
            scratch_shapes=[pltpu.VMEM((tm, tn), jnp.float32)],
        ),
        compiler_params=pltpu.CompilerParams(
            dimension_semantics=("parallel", "parallel", "arbitrary"),
            vmem_limit_bytes=_VMEM_LIMIT_BYTES),
    )


def fused_matmul(a, b, scale, shift, residual=None, activation="none",
                 out_dtype="bfloat16"):
    M, K = a.shape
    K2, N = b.shape
    assert K == K2
    a = a.astype(jnp.bfloat16)
    b = b.astype(jnp.bfloat16)
    fn = _build_fused_matmul(M, K, N, activation, residual is not None, out_dtype)
    args = [a, b,
            scale.astype(jnp.float32).reshape(1, N),
            shift.astype(jnp.float32).reshape(1, N)]
    if residual is not None:
        args.append(residual.astype(jnp.bfloat16))
    return fn(*args)


# ----------------------------------------------------------------------------
# JAX glue: im2col, nearest upsample, BN folding, parameter init
# ----------------------------------------------------------------------------
def im2col3x3(x):  # x: [B,H,W,C] (bf16) -> [B*H*W, 9*C]  (pad=1, stride=1)
    B, H, W, C = x.shape
    xp = jnp.pad(x, ((0, 0), (1, 1), (1, 1), (0, 0)))
    cols = [xp[:, dh:dh + H, dw:dw + W, :] for dh in range(3) for dw in range(3)]
    return jnp.concatenate(cols, axis=-1).reshape(B * H * W, 9 * C)


def upsample2_nearest(x):  # NHWC nearest x2 (== nn.Upsample(scale_factor=2))
    x = jnp.repeat(x, 2, axis=1)
    return jnp.repeat(x, 2, axis=2)


def bn_fold(bn, eps=1e-5):
    s = bn["gamma"] / jnp.sqrt(bn["var"] + eps)
    t = bn["beta"] - bn["mean"] * s
    return s, t


def init_params(key, n_classes=10, latent_dim=128):
    keys = iter(random.split(key, 64))

    def w(shape, std):  # weights stored in bf16 (halves HBM weight traffic)
        return (std * random.normal(next(keys), shape, dtype=jnp.float32)
                ).astype(jnp.bfloat16)

    def bn_default(C):
        return {"gamma": jnp.ones((C,), jnp.float32),
                "beta": jnp.zeros((C,), jnp.float32),
                "mean": jnp.zeros((C,), jnp.float32),
                "var": jnp.ones((C,), jnp.float32)}

    def resblock(C):
        return {"w1": w((9 * C, C), 1.0 / (9 * C) ** 0.5),
                "w2": w((9 * C, C), 1.0 / (9 * C) ** 0.5),
                "bn1": bn_default(C), "bn2": bn_default(C)}

    p = {}
    p["emb"] = random.normal(next(keys), (n_classes, latent_dim),
                             dtype=jnp.float32)
    p["fc_w"] = w((latent_dim, 1024 * 4 * 4), 1.0 / latent_dim ** 0.5)
    p["fc_b"] = jnp.zeros((1024 * 4 * 4,), jnp.float32)

    p["up1_rb"] = resblock(1024)
    p["up1_proj_w"] = w((1024, 512), 1.0 / 1024 ** 0.5)
    p["up1_proj_b"] = jnp.zeros((512,), jnp.float32)

    p["up2_rb1"] = resblock(512)
    p["up2_rb2"] = resblock(512)
    p["up2_proj_w"] = w((512, 256), 1.0 / 512 ** 0.5)
    p["up2_proj_b"] = jnp.zeros((256,), jnp.float32)

    p["up3_rb1"] = resblock(256)
    p["up3_rb2"] = resblock(256)
    p["up3_proj_w"] = w((256, 128), 1.0 / 256 ** 0.5)
    p["up3_proj_b"] = jnp.zeros((128,), jnp.float32)

    p["post_bn"] = bn_default(128)
    # Final conv: real Cout = 3, zero-padded to 128 lanes for a lane-dense
    # output block; the glue slices [:, :3] back out.
    post_w = (1.0 / (9 * 128) ** 0.5 *
              random.normal(next(keys), (9 * 128, 3), dtype=jnp.float32))
    p["post_w"] = jnp.pad(post_w, ((0, 0), (0, 125))).astype(jnp.bfloat16)
    p["post_b"] = jnp.zeros((128,), jnp.float32)
    return p


# ----------------------------------------------------------------------------
# Model forward (all matmul/conv hot paths run in the fused Pallas kernel)
# ----------------------------------------------------------------------------
def apply_resblock(rb, x):
    B, H, W, C = x.shape
    s1, t1 = bn_fold(rb["bn1"])
    s2, t2 = bn_fold(rb["bn2"])
    h = fused_matmul(im2col3x3(x), rb["w1"], s1, t1, activation="relu")
    h = h.reshape(B, H, W, C)
    out = fused_matmul(im2col3x3(h), rb["w2"], s2, t2,
                       residual=x.reshape(B * H * W, C), activation="relu")
    return out.reshape(B, H, W, C)


def conv1x1(x, w, scale, shift, activation="none"):
    B, H, W, C = x.shape
    Cout = w.shape[1]
    out = fused_matmul(x.reshape(B * H * W, C), w, scale, shift,
                       activation=activation)
    return out.reshape(B, H, W, Cout)


def generator_forward(p, z, y):
    # TODO(synk): BatchNorm uses eval-mode running statistics (PyTorch default
    # train() mode would use per-batch statistics).
    B = z.shape[0]
    x = z + p["emb"][y]                                    # embedding gather (glue)
    # Pad batch rows to a multiple of 8 so the fc matmul tile is sublane-dense.
    Bp = max(8, ((B + 7) // 8) * 8)
    x = jnp.pad(x, ((0, Bp - B), (0, 0)))
    x = fused_matmul(x, p["fc_w"],
                     jnp.ones((1024 * 16,), jnp.float32), p["fc_b"])[:B]
    x = x.reshape(B, 1024, 4, 4).transpose(0, 2, 3, 1)     # NCHW .view -> NHWC

    # up1: ResBlock -> 1x1 conv -> x2 nearest (1x1 conv & nearest commute)
    x = apply_resblock(p["up1_rb"], x)
    x = conv1x1(x, p["up1_proj_w"],
                jnp.ones((512,), jnp.float32), p["up1_proj_b"])
    x = upsample2_nearest(x)
    # up2
    x = apply_resblock(p["up2_rb1"], x)
    x = apply_resblock(p["up2_rb2"], x)
    x = conv1x1(x, p["up2_proj_w"],
                jnp.ones((256,), jnp.float32), p["up2_proj_b"])
    x = upsample2_nearest(x)
    # up3: fuse the `post` BatchNorm + ReLU into the 1x1-conv epilogue
    # (per-channel affine + ReLU commute with the nearest upsample).
    x = apply_resblock(p["up3_rb1"], x)
    x = apply_resblock(p["up3_rb2"], x)
    s, t = bn_fold(p["post_bn"])
    x = conv1x1(x, p["up3_proj_w"],
                scale=s, shift=p["up3_proj_b"] * s + t, activation="relu")
    x = upsample2_nearest(x)
    # post: Conv3x3(128 -> 3, padded to 128 lanes) -> Tanh, f32 output
    B_, H, W, C = x.shape
    out = fused_matmul(im2col3x3(x), p["post_w"],
                       jnp.ones((128,), jnp.float32), p["post_b"],
                       activation="tanh", out_dtype="float32")
    out = out[:, :3]
    return out.reshape(B_, H, W, 3).transpose(0, 3, 1, 2)  # NHWC -> NCHW


if __name__ == "__main__":
    key = jax.random.PRNGKey(0)
    kz, ky, kp = jax.random.split(key, 3)
    n_classes, latent_dim, batch = 10, 128, 2

    params = init_params(kp, n_classes=n_classes, latent_dim=latent_dim)
    z = jax.random.normal(kz, (batch, latent_dim), dtype=jnp.float32)
    y = jax.random.randint(ky, (batch,), 0, n_classes)

    out = generator_forward(params, z, y)
    out = jax.block_until_ready(out)

    assert out.shape == (batch, 3, 32, 32), out.shape
    assert bool(jnp.all(jnp.isfinite(out)))
    assert bool(jnp.all(jnp.abs(out) <= 1.0 + 1e-6))  # tanh range
    print("KERNEL_OK")
</pallas_src>

<mosaic_0001>
module attributes {stable_mosaic.version = 11 : i64} {
  func.func @kernel(%arg0: i32, %arg1: i32, %arg2: i32, %arg3: memref<8x128xbf16, #tpu.memory_space<vmem>>, %arg4: memref<128x512xbf16, #tpu.memory_space<vmem>>, %arg5: memref<1x512xf32, #tpu.memory_space<vmem>>, %arg6: memref<1x512xf32, #tpu.memory_space<vmem>>, %arg7: memref<8x512xbf16, #tpu.memory_space<vmem>>, %arg8: memref<8x512xf32, #tpu.memory_space<vmem>>) attributes {dimension_semantics = [#tpu.dimension_semantics<parallel>, #tpu.dimension_semantics<parallel>, #tpu.dimension_semantics<arbitrary>], iteration_bounds = array<i64: 1, 32, 1>, scalar_prefetch = 0 : i64, scratch_operands = 1 : i64, tpu.core_type = #tpu.core_type<tc>, window_params = [{transform_indices = @transform_0, window_bounds = array<i64: 8, 128>}, {transform_indices = @transform_1, window_bounds = array<i64: 128, 512>}, {transform_indices = @transform_2, window_bounds = array<i64: 1, 512>}, {transform_indices = @transform_3, window_bounds = array<i64: 1, 512>}, {transform_indices = @transform_4, window_bounds = array<i64: 8, 512>}]} {
    %c0_i32 = arith.constant 0 : i32
    %0 = arith.cmpi eq, %arg2, %c0_i32 : i32
    %1 = arith.extui %0 : i1 to i32
    %c0_i32_0 = arith.constant 0 : i32
    %2 = arith.cmpi ne, %1, %c0_i32_0 : i32
    scf.if %2 {
      %cst_10 = arith.constant 0.000000e+00 : f32
      %12 = vector.broadcast %cst_10 : f32 to vector<8x512xf32>
      %c0_11 = arith.constant 0 : index
      %c0_12 = arith.constant 0 : index
      %13 = vector.load %arg8[%c0_11, %c0_12] : memref<8x512xf32, #tpu.memory_space<vmem>>, vector<8x512xf32>
      tpu.vector_store %arg8[%c0_11, %c0_12], %12 {strides = array<i32>} : memref<8x512xf32, #tpu.memory_space<vmem>>, vector<8x512xf32>,
    } else {
    }
    %c0 = arith.constant 0 : index
    %c0_1 = arith.constant 0 : index
    %3 = vector.load %arg8[%c0, %c0_1] : memref<8x512xf32, #tpu.memory_space<vmem>>, vector<8x512xf32>
    %c0_2 = arith.constant 0 : index
    %c0_3 = arith.constant 0 : index
    %4 = vector.load %arg3[%c0_2, %c0_3] : memref<8x128xbf16, #tpu.memory_space<vmem>>, vector<8x128xbf16>
    %c0_4 = arith.constant 0 : index
    %c0_5 = arith.constant 0 : index
    %5 = vector.load %arg4[%c0_4, %c0_5] : memref<128x512xbf16, #tpu.memory_space<vmem>>, vector<128x512xbf16>
    %cst = arith.constant dense<0.000000e+00> : vector<8x512xf32>
    %6 = tpu.matmul %4, %5, %cst {dimension_numbers = #tpu.dot_dimension_numbers<[1], [0], [0], [1], [0, 0, 1, 1], [], []>} : vector<8x128xbf16>, vector<128x512xbf16>, vector<8x512xf32> -> vector<8x512xf32>
    %7 = arith.addf %3, %6 : vector<8x512xf32>
    %c0_6 = arith.constant 0 : index
    %c0_7 = arith.constant 0 : index
    %8 = vector.load %arg8[%c0_6, %c0_7] : memref<8x512xf32, #tpu.memory_space<vmem>>, vector<8x512xf32>
    tpu.vector_store %arg8[%c0_6, %c0_7], %7 {strides = array<i32>} : memref<8x512xf32, #tpu.memory_space<vmem>>, vector<8x512xf32>,
    %c0_i32_8 = arith.constant 0 : i32
    %9 = arith.cmpi eq, %arg2, %c0_i32_8 : i32
    %10 = arith.extui %9 : i1 to i32
    %c0_i32_9 = arith.constant 0 : i32
    %11 = arith.cmpi ne, %10, %c0_i32_9 : i32
    scf.if %11 {
      %c0_10 = arith.constant 0 : index
      %c0_11 = arith.constant 0 : index
      %12 = vector.load %arg8[%c0_10, %c0_11] : memref<8x512xf32, #tpu.memory_space<vmem>>, vector<8x512xf32>
      %c0_12 = arith.constant 0 : index
      %c0_13 = arith.constant 0 : index
      %13 = vector.load %arg5[%c0_12, %c0_13] : memref<1x512xf32, #tpu.memory_space<vmem>>, vector<1x512xf32>
      %14 = vector.broadcast %13 : vector<1x512xf32> to vector<8x512xf32>
      %15 = arith.mulf %12, %14 : vector<8x512xf32>
      %c0_14 = arith.constant 0 : index
      %c0_15 = arith.constant 0 : index
      %16 = vector.load %arg6[%c0_14, %c0_15] : memref<1x512xf32, #tpu.memory_space<vmem>>, vector<1x512xf32>
      %17 = vector.broadcast %16 : vector<1x512xf32> to vector<8x512xf32>
      %18 = arith.addf %15, %17 : vector<8x512xf32>
      %19 = arith.truncf %18 : vector<8x512xf32> to vector<8x512xbf16>
      %c0_16 = arith.constant 0 : index
      %c0_17 = arith.constant 0 : index
      %20 = vector.load %arg7[%c0_16, %c0_17] : memref<8x512xbf16, #tpu.memory_space<vmem>>, vector<8x512xbf16>
      tpu.vector_store %arg7[%c0_16, %c0_17], %19 {strides = array<i32>} : memref<8x512xbf16, #tpu.memory_space<vmem>>, vector<8x512xbf16>,
    } else {
    }
    return
  }
  func.func @transform_0(%arg0: i32, %arg1: i32, %arg2: i32) -> (i32, i32) {
    %c0_i32 = arith.constant 0 : i32
    return %arg0, %arg2 : i32, i32
  }
  func.func @transform_1(%arg0: i32, %arg1: i32, %arg2: i32) -> (i32, i32) {
    %c0_i32 = arith.constant 0 : i32
    return %arg2, %arg1 : i32, i32
  }
  func.func @transform_2(%arg0: i32, %arg1: i32, %arg2: i32) -> (i32, i32) {
    %c0_i32 = arith.constant 0 : i32
    %c0_i32_0 = arith.constant 0 : i32
    return %c0_i32, %arg1 : i32, i32
  }
  func.func @transform_3(%arg0: i32, %arg1: i32, %arg2: i32) -> (i32, i32) {
    %c0_i32 = arith.constant 0 : i32
    %c0_i32_0 = arith.constant 0 : i32
    return %c0_i32, %arg1 : i32, i32
  }
  func.func @transform_4(%arg0: i32, %arg1: i32, %arg2: i32) -> (i32, i32) {
    %c0_i32 = arith.constant 0 : i32
    return %arg0, %arg1 : i32, i32
  }
}

</mosaic_0001>

<bundles_post_ra>
// kernel: tpu_custom_call.1
= control target key start
LH: loop header
LB: loop body
LE: loop exit
PB: predicated region body
PF: predicated region fallthrough
CT: control target
= control target key end

     0   :  { %s1569_s0 = inlined_call_operand.hbm [shape: bf16[8,128], index: 0, kind: input, shape index: {}]   ;;  %s1570_s1 = inlined_call_operand.hbm [shape: bf16[128,16384], index: 1, kind: input, shape index: {}]   ;;  %s1571_s2 = inlined_call_operand.hbm [shape: f32[1,16384], index: 2, kind: input, shape index: {}]   ;;  %s1572_s3 = inlined_call_operand.hbm [shape: f32[1,16384], index: 3, kind: input, shape index: {}]   ;;  %s1573_s4 = inlined_call_operand.hbm [shape: bf16[8,16384], index: 4, kind: output, shape index: {}]  }
   0x1   :  { %1579 = sst [smem:[#allocation17_spill]] %s1570_s1 }
   0x2   :  { %9 = vsyncpa [#allocation4], 0 }
   0x3   :  { %10 = vsyncpa [#allocation7], 0 }
   0x4   :  { %12 = vsyncpa [#allocation7 + $0x1], 0 }
   0x5   :  { %13 = vsyncpa [#allocation10], 0 }
   0x6   :  { %15 = vsyncpa [#allocation10 + $0x1], 0 }
   0x7   :  { %16 = vsyncpa [#allocation5], 0 }
   0x8   :  { %18 = vsyncpa [#allocation5 + $0x1], 0  ;;  %s1312_s15 = smov 0   ;;  %s1314_s16 = smov 0  }
   0x9   :  { %s1316_s17 = smov 0   ;;  %s1318_s18 = smov 0  }
   0xa   :  { %s1320_s19 = smov 0   ;;  %s1322_s20 = smov 0  }
   0xb LB: > { %s39_s21 = sadd.s32 1, %s1272_s19  ;;  %s80_s22 = sadd.s32 1, %s1264_s17  ;;  %s1276_s20 = sphi %s1322_s20, %s24_s20   ;;  %s1272_s19 = sphi %s1320_s19, %s1599_s19   ;;  %s1268_s18 = sphi %s1318_s18, %s1598_s18   ;;  %s1264_s17 = sphi %s1316_s17, %s1597_s17   ;;  %s1260_s16 = sphi %s1314_s16, %s1596_s16   ;;  %s1256_s15 = sphi %s1312_s15, %s1595_s15  }
   0xc   : > { %p41_p0 = scmp.ge.s32.totalorder %s39_s21, 32  ;;  %p87_p1 = scmp.ne.s32.totalorder %s1264_s17, %s1260_s16 }
   0xd   : > { %p88_p2 = scmp.eq.s32.totalorder %s1276_s20, 0  ;;  %p974_p4 = scmp.lt.s32.totalorder %s1276_s20, 32 }
   0xe   : > { %s1601_s21 = smov (%p41_p0, %s39_s21), 0  ;;  %s211_s24 = sand.u32 1, %s1276_s20  }
   0xf   : > { %1580 = sst [smem:[#allocation16_spill]] %s1601_s21  ;;  %p89_p3 = por %p88_p2, %p87_p1 }
  0x10   : > { %s76_s23 = ssub.s32 %s1272_s19, %s1601_s21  ;;  %s1357_s25 = sand.u32 1, %s1264_s17  }
  0x11   : > { %p78_p5 = scmp.eq.s32.totalorder %s76_s23, 0  ;;  %s937_s26 = sshll.u32 %s1272_s19, 8 }
  0x12   : > { %s883_s28 = sshll.u32 %s1357_s25, 8  ;;  %s1581_s1 = sld [smem:[#allocation17_spill]] }
  0x13   : > { %s1361_s27 = scalar_select %p78_p5, %s1264_s17, %s80_s22  }
  0x14   : > { %p1367_p6 = pnand %p974_p4, %p89_p3  ;;  %s215_s7 = scalar_lea.vmem [#allocation6], %s883_s28 }
  0x15   : > { %s225_s8 = sshll.u32 %s215_s7, 4  ;;  %s1371_s9 = scalar_lea.sflag [#allocation7], %s211_s24  ;;  %s226_s8 = int_to_ptr.vmem [resolvable:$true] %s225_s8 }
  0x16   : > { %p1577_p7 = pneg %p1367_p6  ;;  %s1091_s10 = scalar_lea.vmem %s226_s8, 4096 }
  0x17   : > { %p1092_p8 = scmp.ne.s32.totalorder %s226_s8, %s1091_s10  ;;  %s1278_s11 = smov [#allocation6]  }
  0x18   : > { %s224_s5 = scalar_lea.hbm %s1581_s1, %s937_s26  ;;  %s1096_s12 = sshll.u32 %s1278_s11, 4  ;;  %s1097_s12 = int_to_ptr.vmem [resolvable:$false] %s1096_s12 }
  0x19   : > { %p1094_p9 = pnand %p1092_p8, %p1577_p7  ;;  %s1098_s13 = scalar_lea.vmem %s1097_s12, 8192 }
  0x1a   : > { %p1099_p11 = scmp.lt.s32.totalorder %s226_s8, %s1097_s12  ;;  %p1100_p12 = scmp.lt.s32.totalorder %s1098_s13, %s1091_s10 }
  0x1b   : > { %p1095_p10 = pneg %p1094_p9 }
  0x1c   : > { %p1101_p13 = por %p1100_p12, %p1099_p11 }
  0x1e   : > { %p1102_p0 = pnand %p1101_p13, %p1095_p10 }
  0x20   : > { %1105 = shalt.err (!%p1102_p0)
}
  0x21   : > { %s1279_s14 = smov 8192   ;;  %s1280_s22 = smov 256  }
  0x22   : > { %s1281_s23 = smov 16   ;;  %s1382_s24 = sadd.s32 4294967295, %s1276_s20  }
  0x23   : > { %962 = dma.hbm_to_vmem [thread:$0]  (!%p1367_p6), %s224_s5, 4096, %s226_s8, %s1371_s9, %s1279_s14, %s1280_s22, %s1281_s23  }
  0x24   : > { %s879_s26 = sadd.s32 4294967294, %s1276_s20   ;;  %p93_p2 = scmp.ne.s32.totalorder %s1260_s16, %s1256_s15 }
  0x25   : > { %p1576_p3 = scmp.eq.s32.totalorder %s1382_s24, 0  ;;  %p171_p4 = scmp.eq.s32.totalorder %s1382_s24, 31 }
  0x26   : > { %p177_p5 = scmp.eq.s32.totalorder %s879_s26, 31  ;;  %p880_p9 = scmp.ge.s32.totalorder %s1276_s20, 1 }
  0x27   : > { %p1391_p8 = por %p1576_p3, %p93_p2  ;;  %p1399_p10 = por %p171_p4, %p87_p1 }
  0x28   : > { %p1403_p11 = por %p177_p5, %p93_p2  ;;  %p184_p12 = scmp.lt.s32.totalorder %s1276_s20, 33 }
  0x29   : > { %s1583_s28 = scalar_select %p1391_p8, 1, 0 }
  0x2a   : > { %s1584_s29 = scalar_select %p1399_p10, 1, 0 }
  0x2b   : > { %s1585_s30 = scalar_select %p1403_p11, 1, 0 }
  0x2c   : > { %s886_s5 = sshll.u32 %s1357_s25, 2  ;;  %p1409_p13 = pnand %p880_p9, %p184_p12 }
  0x2d   : > { %s1282_s8 = smov [#allocation3]   ;;  %s938_s11 = sshll.u32 %s1272_s19, 6 }
  0x2e   : > { %s200_s10 = sshll.u32 %s1282_s8, 4  ;;  %p955_p1 = pneg %p1409_p13  ;;  %s1413_s10 = int_to_ptr.vmem [resolvable:$true] %s200_s10 }
  0x2f   : > { %s245_s14 = scalar_lea.hbm %s1571_s2, %s938_s11  ;;  %s239_s22 = scalar_lea.vmem [#allocation8], %s886_s5 }
  0x30   : > { %s247_s23 = sshll.u32 %s239_s22, 4  ;;  %p1427_p0 = pnand %p955_p1, %p1576_p3  ;;  %s248_s23 = int_to_ptr.vmem [resolvable:$true] %s247_s23 }
  0x31   : > { %s1119_s8 = scalar_lea.vmem %s248_s23, 64  ;;  %s1283_s1 = smov [#allocation8]  }
  0x32   : > { %p1120_p2 = scmp.ne.s32.totalorder %s248_s23, %s1119_s8  ;;  %s1124_s21 = sshll.u32 %s1283_s1, 4  ;;  %s1125_s21 = int_to_ptr.vmem [resolvable:$false] %s1124_s21 }
  0x33   : > { %s1126_s12 = scalar_lea.vmem %s1125_s21, 128  ;;  %p1127_p9 = scmp.lt.s32.totalorder %s248_s23, %s1125_s21 }
  0x34   : > { %p1122_p4 = pnand %p1120_p2, %p1577_p7  ;;  %p1128_p12 = scmp.lt.s32.totalorder %s1126_s12, %s1119_s8 }
  0x36   : > { %p1123_p5 = pneg %p1122_p4  ;;  %p1129_p11 = por %p1128_p12, %p1127_p9 }
  0x38   : > { %p1130_p10 = pnand %p1129_p11, %p1123_p5 }
  0x3a   : > { %1133 = shalt.err (!%p1130_p10)
}
  0x3b   : > { %965 = dma.hbm_to_vmem [thread:$0]  (!%p1367_p6), %s245_s14, 64, %s248_s23, %s1371_s9  }
  0x3c   : > { %p1136_p1 = pneg %p1427_p0  ;;  %s1145_s13 = scalar_lea.vmem %s1413_s10, 64 }
  0x3d   : > { %p1146_p2 = scmp.ne.s32.totalorder %s1413_s10, %s1145_s13  ;;  %p1153_p7 = scmp.lt.s32.totalorder %s1413_s10, %s1413_s10 }
  0x3e   : > { %p1154_p8 = scmp.lt.s32.totalorder %s1145_s13, %s1145_s13 }
  0x3f   : > { %p1148_p4 = pnand %p1146_p2, %p1136_p1 }
  0x40   : > { %p1155_p9 = por %p1154_p8, %p1153_p7 }
  0x41   : > { %p1149_p3 = pneg %p1148_p4 }
  0x43   : > { %p1156_p11 = pnand %p1155_p9, %p1149_p3 }
  0x45   : > { %1159 = shalt.err (!%p1156_p11)
}
  0x46   : > { %958 = dma.hbm_to_vmem [thread:$0]  (!%p1427_p0), %s1569_s0, 64, %s1413_s10, [#allocation4]  }
  0x47   : > { %s264_s22 = scalar_lea.hbm %s1572_s3, %s938_s11  ;;  %s258_s23 = scalar_lea.vmem [#allocation9], %s886_s5 }
  0x48   : > { %s266_s8 = sshll.u32 %s258_s23, 4  ;;  %s255_s12 = scalar_lea.sflag [#allocation10], %s1357_s25  ;;  %s267_s8 = int_to_ptr.vmem [resolvable:$true] %s266_s8 }
  0x49   : > { %s1173_s26 = scalar_lea.vmem %s267_s8, 64  ;;  %p1588_p3 = pneg %p1367_p6 }
  0x4a   : > { %p1174_p7 = scmp.ne.s32.totalorder %s267_s8, %s1173_s26  ;;  %s1284_s13 = smov [#allocation9]  }
  0x4b   : > { %s1178_s1 = sshll.u32 %s1284_s13, 4  ;;  %s1179_s1 = int_to_ptr.vmem [resolvable:$false] %s1178_s1 }
  0x4c   : > { %p1176_p8 = pnand %p1174_p7, %p1588_p3  ;;  %s1180_s10 = scalar_lea.vmem %s1179_s1, 128 }
  0x4d   : > { %p1181_p0 = scmp.lt.s32.totalorder %s267_s8, %s1179_s1  ;;  %p1182_p5 = scmp.lt.s32.totalorder %s1180_s10, %s1173_s26 }
  0x4e   : > { %p1177_p10 = pneg %p1176_p8 }
  0x4f   : > { %p1183_p12 = por %p1182_p5, %p1181_p0 }
  0x51   : > { %p1184_p1 = pnand %p1183_p12, %p1177_p10 }
  0x53   : > { %1187 = shalt.err (!%p1184_p1)
}
  0x54   : > { %968 = dma.hbm_to_vmem [thread:$0]  (!%p1367_p6), %s264_s22, 64, %s267_s8, %s255_s12  }
  0x55   : > { %275 = sbr.rel (%p1409_p13) target bundleno = 347 (0x15b), region = 36  ;;  %p1589_p2 = scmp.eq.s32.totalorder (!%p1409_p13), %s1382_s24, 0 }
  0x5a   : > { %1239 = dma.done.wait (%p1589_p2), [#allocation4], 64   ;;  %p1590_p4 = pmov %p1589_p2 }
  0x5b   : > { %s281_s25 = sand.u32 1, %s1382_s24   ;;  %s1470_s5 = sand.u32 1, %s1260_s16  }
  0x5c   : > { %1241 = vsyncadd (%p1590_p4), [#allocation4], 4294967232  ;;  %s894_s11 = sshll.u32 %s1470_s5, 8  ;;  %s282_s21 = scalar_lea.sflag [#allocation7], %s281_s25 }
  0x5d   : > { %s1473_s6 = scalar_lea.vmem [#allocation6], %s894_s11  ;;  %p1591_p6 = scmp.ne.s32.totalorder %s1583_s28, 0 }
  0x5f   : > { %1243 = dma.done.wait (%p1591_p6), %s282_s21, 4160  }
  0x60   : > { %1245 = vsyncadd (%p1591_p6), %s282_s21, 4294963136  ;;  %s895_s7 = sshll.u32 %s1470_s5, 2  ;;  %s300_s14 = scalar_lea.sflag [#allocation10], %s1470_s5 }
  0x61   : > { %s1480_s9 = scalar_lea.vmem [#allocation8], %s895_s7  ;;  %s1483_s24 = scalar_lea.vmem [#allocation9], %s895_s7 }
  0x62   : > { %1247 = dma.done.wait (%p1591_p6), %s300_s14, 64  }
  0x63   : > { %1249 = vsyncadd (%p1591_p6), %s300_s14, 4294967232  ;;  %v1285_v0 = vmov 0   ;;  %v1030_v1 = vld [vmem:[%s1473_s6 + $0xe4] ss:$16 sps:$4 sm:$0xff]   ;;  %v1032_v2 = vld [vmem:[%s1473_s6 + $0xec] ss:$16 sps:$4 sm:$0xff]   ;;  %v648_v34 = vlaneseq }
  0x64   : > { %581 = vmatprep.mubr.bf16.mxu0 %v1285_v0  ;;  %622 = vmatprep.mubr.bf16.mxu1 %v1285_v0  ;;  %v1034_v3 = vld [vmem:[%s1473_s6 + $0xe0] ss:$16 sps:$4 sm:$0xff]   ;;  %v1035_v4 = vld [vmem:[%s1473_s6 + $0xe8] ss:$16 sps:$4 sm:$0xff]   ;;  %v1036_v5 = vld [vmem:[%s1473_s6 + $0xc4] ss:$16 sps:$4 sm:$0xff]  }
  0x65   : > { %549 = vmatprep.subr.bf16.mxu0 %v1030_v1  ;;  %590 = vmatprep.subr.bf16.mxu1 %v1032_v2  ;;  %v1038_v6 = vld [vmem:[%s1473_s6 + $0xcc] ss:$16 sps:$4 sm:$0xff]   ;;  %v1040_v7 = vld [vmem:[%s1473_s6 + $0xc0] ss:$16 sps:$4 sm:$0xff]   ;;  %v1041_v8 = vld [vmem:[%s1473_s6 + $0xc8] ss:$16 sps:$4 sm:$0xff]  }
  0x66   : > { %550 = vmatpush1.bf16.msra.mxu0 %v1034_v3  ;;  %591 = vmatpush1.bf16.msra.mxu1 %v1035_v4  ;;  %v1042_v9 = vld [vmem:[%s1473_s6 + $0xa4] ss:$16 sps:$4 sm:$0xff]   ;;  %v1044_v10 = vld [vmem:[%s1473_s6 + $0xac] ss:$16 sps:$4 sm:$0xff]   ;;  %v1046_v11 = vld [vmem:[%s1473_s6 + $0xa0] ss:$16 sps:$4 sm:$0xff]  }
  0x67   : > { %551 = vmatprep.subr.bf16.mxu0 %v1036_v5  ;;  %592 = vmatprep.subr.bf16.mxu1 %v1038_v6  ;;  %v1047_v12 = vld [vmem:[%s1473_s6 + $0xa8] ss:$16 sps:$4 sm:$0xff]   ;;  %v1048_v13 = vld [vmem:[%s1473_s6 + $0x84] ss:$16 sps:$4 sm:$0xff]   ;;  %v1050_v14 = vld [vmem:[%s1473_s6 + $0x8c] ss:$16 sps:$4 sm:$0xff]  }
  0x68   : > { %v1052_v15 = vld [vmem:[%s1473_s6 + $0x80] ss:$16 sps:$4 sm:$0xff]   ;;  %v1053_v16 = vld [vmem:[%s1473_s6 + $0x88] ss:$16 sps:$4 sm:$0xff]   ;;  %v1054_v17 = vld [vmem:[%s1473_s6 + $0x64] ss:$16 sps:$4 sm:$0xff]  }
  0x69   : > { %v1056_v18 = vld [vmem:[%s1473_s6 + $0x6c] ss:$16 sps:$4 sm:$0xff]   ;;  %v1058_v19 = vld [vmem:[%s1473_s6 + $0x60] ss:$16 sps:$4 sm:$0xff]   ;;  %v1059_v20 = vld [vmem:[%s1473_s6 + $0x68] ss:$16 sps:$4 sm:$0xff]  }
  0x6a   : > { %552 = vmatpush1.bf16.msra.mxu0 %v1040_v7  ;;  %593 = vmatpush1.bf16.msra.mxu1 %v1041_v8  ;;  %v1060_v21 = vld [vmem:[%s1473_s6 + $0x44] ss:$16 sps:$4 sm:$0xff]   ;;  %v1062_v22 = vld [vmem:[%s1473_s6 + $0x4c] ss:$16 sps:$4 sm:$0xff]   ;;  %v1064_v23 = vld [vmem:[%s1473_s6 + $0x40] ss:$16 sps:$4 sm:$0xff]  }
  0x6b   : > { %553 = vmatprep.subr.bf16.mxu0 %v1042_v9  ;;  %594 = vmatprep.subr.bf16.mxu1 %v1044_v10  ;;  %v1065_v24 = vld [vmem:[%s1473_s6 + $0x48] ss:$16 sps:$4 sm:$0xff]   ;;  %v1066_v25 = vld [vmem:[%s1473_s6 + $0x24] ss:$16 sps:$4 sm:$0xff]   ;;  %v1068_v26 = vld [vmem:[%s1473_s6 + $0x2c] ss:$16 sps:$4 sm:$0xff]  }
  0x6c   : > { %v1070_v27 = vld [vmem:[%s1473_s6 + $0x20] ss:$16 sps:$4 sm:$0xff]   ;;  %v1071_v28 = vld [vmem:[%s1473_s6 + $0x28] ss:$16 sps:$4 sm:$0xff]   ;;  %v1072_v29 = vld [vmem:[%s1473_s6 + $0x4] ss:$16 sps:$4 sm:$0xff]  }
  0x6d   : > { %v1074_v30 = vld [vmem:[%s1473_s6 + $0xc] ss:$16 sps:$4 sm:$0xff]   ;;  %v1076_v31 = vld [vmem:[%s1473_s6] ss:$16 sps:$4 sm:$0xff]   ;;  %v1077_v32 = vld [vmem:[%s1473_s6 + $0x8] ss:$16 sps:$4 sm:$0xff]  }
  0x6e   : > { %554 = vmatpush1.bf16.msra.mxu0 %v1046_v11  ;;  %595 = vmatpush1.bf16.msra.mxu1 %v1047_v12  ;;  %v356_v33 = vld [vmem:[#allocation3] sm:$0xf]  ;;  %v649_v35 = vshrl.u32 %v648_v34, 7  ;;  %v646_v38 = vld [vmem:[%s1480_s9] sm:$0xf]  ;;  %s897_s28 = sshll.u32 %s1470_s5, 4 }
  0x6f   : > { %555 = vmatprep.subr.bf16.mxu0 %v1048_v13  ;;  %596 = vmatprep.subr.bf16.mxu1 %v1050_v14  ;;  %v672_v42 = vld [vmem:[%s1483_s24] sm:$0xf]  ;;  %s942_s22 = sshll.u32 %s1268_s18, 8  ;;  %s337_s23 = scalar_lea.vmem [#allocation11], %s897_s28 }
  0x70   : > { %v650_v36 = vsub.s32 0, %v649_v35  ;;  %v658_v37 = vsub.s32 2, %v649_v35  ;;  %v654_v39 = vsub.s32 1, %v649_v35  ;;  %v662_v40 = vsub.s32 3, %v649_v35  ;;  %s733_s8 = sshll.u32 %s337_s23, 4  ;;  %s1528_s13 = scalar_lea.hbm %s1573_s4, %s942_s22  ;;  %s734_s8 = int_to_ptr.vmem [resolvable:$true] %s733_s8 }
  0x71   : > { %s717_s18 = scalar_lea.sflag [#allocation5], %s1470_s5  ;;  %s1188_s1 = scalar_lea.vmem %s734_s8, 256 }
  0x72   : > { %556 = vmatpush1.bf16.msra.mxu0 %v1052_v15  ;;  %597 = vmatpush1.bf16.msra.mxu1 %v1053_v16  ;;  %v651_v41 = vrot.slane %v646_v38, %v650_v36  ;;  %v659_v43 = vrot.slane %v646_v38, %v658_v37  ;;  %v655_v44 = vrot.slane %v646_v38, %v654_v39  ;;  %p1189_p13 = scmp.ne.s32.totalorder %s734_s8, %s1188_s1  ;;  %p1592_p9 = scmp.ne.s32.totalorder %s1584_s29, 0 }
  0x73   : > { %557 = vmatprep.subr.bf16.mxu0 %v1054_v17  ;;  %598 = vmatprep.subr.bf16.mxu1 %v1056_v18  ;;  %v663_v45 = vrot.slane %v646_v38, %v662_v40  ;;  %v677_v47 = vrot.slane %v672_v42, %v650_v36  ;;  %v685_v49 = vrot.slane %v672_v42, %v658_v37  ;;  %s1286_s10 = smov [#allocation11]  }
  0x74   : > { %v681_v52 = vrot.slane %v672_v42, %v654_v39  ;;  %v689_v53 = vrot.slane %v672_v42, %v662_v40  ;;  %p1190_p11 = pnand %p1189_p13, %p1592_p9  ;;  %s1192_s25 = sshll.u32 %s1286_s10, 4  ;;  %s1193_s25 = int_to_ptr.vmem [resolvable:$false] %s1192_s25 }
  0x75   : > { %s1194_s11 = scalar_lea.vmem %s1193_s25, 512  ;;  %p1195_p3 = scmp.lt.s32.totalorder %s734_s8, %s1193_s25 }
  0x76   : > { %558 = vmatpush1.bf16.msra.mxu0 %v1058_v19  ;;  %599 = vmatpush1.bf16.msra.mxu1 %v1059_v20  ;;  %p1191_p7 = pneg %p1190_p11  ;;  %p1196_p8 = scmp.lt.s32.totalorder %s1194_s11, %s1188_s1 }
  0x77   : > { %559 = vmatprep.subr.bf16.mxu0 %v1060_v21  ;;  %600 = vmatprep.subr.bf16.mxu1 %v1062_v22 }
  0x78   : > { %p1197_p10 = por %p1196_p8, %p1195_p3 }
  0x7a   : > { %560 = vmatpush1.bf16.msra.mxu0 %v1064_v23  ;;  %601 = vmatpush1.bf16.msra.mxu1 %v1065_v24  ;;  %p1198_p0 = pnand %p1197_p10, %p1191_p7 }
  0x7b   : > { %561 = vmatprep.subr.bf16.mxu0 %v1066_v25  ;;  %602 = vmatprep.subr.bf16.mxu1 %v1068_v26 }
  0x7e   : > { %562 = vmatpush1.bf16.msra.mxu0 %v1070_v27  ;;  %603 = vmatpush1.bf16.msra.mxu1 %v1071_v28 }
  0x7f   : > { %563 = vmatprep.subr.bf16.mxu0 %v1072_v29  ;;  %604 = vmatprep.subr.bf16.mxu1 %v1074_v30 }
  0x82   : > { %564 = vmatpush1.bf16.msra.mxu0 %v1076_v31  ;;  %605 = vmatpush1.bf16.msra.mxu1 %v1077_v32 }
  0x85   : > { %582 = vmatmul.mubr.bf16.vlgmr.msra.gmra.mxu0 %v356_v33  ;;  %623 = vmatmul.mubr.bf16.vlgmr.msra.gmra.mxu1 %v356_v33 }
 0x145   : > { %v583_v46 = vpop.f32.mrf.mxu0  ;;  %v624_v48 = vpop.f32.mrf.mxu1 }
 0x146   : > { %v668_v50 = vmul.f32 %v651_v41, %v583_v46  ;;  %v670_v51 = vmul.f32 %v659_v43, %v624_v48 }
 0x147   : > { %v585_v54 = vpop.f32.mrf.mxu0  ;;  %v626_v55 = vpop.f32.mrf.mxu1 }
 0x148   : > { %v669_v56 = vmul.f32 %v655_v44, %v585_v54  ;;  %v671_v57 = vmul.f32 %v663_v45, %v626_v55  ;;  %v694_v60 = vadd.f32 %v677_v47, %v668_v50  ;;  %v696_v61 = vadd.f32 %v685_v49, %v670_v51 }
 0x149   : > { %v587_v58 = vpop.f32.mrf.mxu0  ;;  %v628_v59 = vpop.f32.mrf.mxu1 }
 0x14a   : > { %v695_v62 = vadd.f32 %v681_v52, %v669_v56  ;;  %v697_v63 = vadd.f32 %v689_v53, %v671_v57 }
 0x14b   : > { %v588_v0 = vpop.f32.mrf.mxu0  ;;  %v629_v1 = vpop.f32.mrf.mxu1 }
 0x14c   : > { %v940_v2 = vpack.c.bf16 %v695_v62, %v694_v60  ;;  %v941_v3 = vpack.c.bf16 %v697_v63, %v696_v61 }
 0x14e   : > { %714 = vst [vmem:[%s337_s23] sm:$0xff] %v940_v2  ;;  %715 = vst [vmem:[%s337_s23 + $0x8] sm:$0xff] %v941_v3 }
 0x14f   : > { %1201 = shalt.err (!%p1198_p0)
}
 0x150   : > { %s1202_s21 = scalar_lea.hbm %s1528_s13, 256  ;;  %s1206_s7 = scalar_lea.hbm %s1573_s4, 8192 }
 0x151   : > { %p1203_p5 = scmp.ne.s32.totalorder %s1528_s13, %s1202_s21  ;;  %p1207_p2 = scmp.lt.s32.totalorder %s1528_s13, %s1573_s4 }
 0x152   : > { %p1208_p4 = scmp.lt.s32.totalorder %s1206_s7, %s1202_s21 }
 0x153   : > { %p1204_p12 = pnand %p1203_p5, %p1592_p9 }
 0x154   : > { %p1209_p6 = por %p1208_p4, %p1207_p2 }
 0x155   : > { %p1205_p1 = pneg %p1204_p12 }
 0x157   : > { %p1210_p13 = pnand %p1209_p6, %p1205_p1 }
 0x159   : > { %1213 = shalt.err (!%p1210_p13)
}
 0x15a   : > { %953 = dma.vmem_to_hbm [thread:$0]  (%p1592_p9), %s734_s8, 256, %s1528_s13, %s717_s18  }
 0x15b PF: > { %p976_p11 = scmp.ge.s32.totalorder %s1276_s20, 2  ;;  %s745_s24 = sand.u32 1, %s1256_s15  }
 0x15c   : > { %p1593_p7 = scmp.ne.s32.totalorder %s1585_s30, 0  ;;  %s746_s28 = scalar_lea.sflag [#allocation5], %s745_s24 }
 0x15e   : > { %p970_p3 = pnand %p976_p11, %p1593_p7 }
 0x160   : > { %p971_p8 = pneg %p970_p3 }
 0x162   : > { %1251 = dma.done.wait (%p971_p8), %s746_s28, 256  }
 0x163   : > { %1253 = vsyncadd (%p971_p8), %s746_s28, 4294967040  ;;  %s24_s20 = sadd.s32 1, %s1276_s20   ;;  %s1594_s29 = sld [smem:[#allocation16_spill]] }
 0x164   : > { %p21_p10 = scmp.ge.s32.totalorder %s24_s20, 34   ;;  %s1595_s15 = smov %s1260_s16 }
 0x165   : > { %s1596_s16 = smov %s1264_s17  ;;  %s1597_s17 = smov %s1361_s27 }
 0x166   : > { %s1598_s18 = smov %s1272_s19  ;;  %23 = sbr.rel (!%p21_p10) target bundleno = 11 (0xb), region = 119 }
 0x169   : > { %s1599_s19 = smov %s1594_s29 }
 0x16b   :  { %751 = vsyncpa [#allocation4], 1 }
 0x16c   :  { %753 = vsyncpa [#allocation4 + $0x1], 1 }
 0x16d   :  { %754 = vsyncpa [#allocation7], 1 }
 0x16e   :  { %756 = vsyncpa [#allocation7 + $0x1], 1 }
 0x16f   :  { %757 = vsyncpa [#allocation10], 1 }
 0x170   :  { %759 = vsyncpa [#allocation10 + $0x1], 1 }
 0x171   :  { %760 = vsyncpa [#allocation5], 1 }
 0x172   :  { %762 = vsyncpa [#allocation5 + $0x1], 1 }

</bundles_post_ra>
